<compile_context>
chip_gen: v5e
topology: v5e:2x2
jax: 0.10.0
libtpu: 0.0.40
codegen_flags: <defaults>
</compile_context>

<pallas_src>
import functools

import jax
import jax.numpy as jnp
from jax.experimental import pallas as pl
from jax.experimental.pallas import tpu as pltpu

H_IN = 256
N_ACT = 3
N_PAD = 128      # pad the 3 output classes to a full 128-lane tile for the MXU
MAX_TB = 512     # batch-tile rows (multiple of 8 and 128)
CHUNK = 256      # post-matmul processing chunk (keeps transpose within vreg file)


def _round_up(x, m):
    return ((x + m - 1) // m) * m


def _catch_action_kernel(h_ref, w_ref, b_ref, u_ref, logpi_ref, a_ref, *,
                         greedy, chunk):
    tb = h_ref.shape[0]
    # Static Python loop over row-chunks; chunk divides tb (or equals it).
    for start in range(0, tb, chunk):
        rows = pl.ds(start, chunk)

        # fc(h): [chunk, 256] bf16 @ [256, 128] bf16 -> [chunk, 128] f32
        # (only the first 3 columns are real; bias added in f32).
        logits = jnp.dot(h_ref[rows, :], w_ref[...],
                         preferred_element_type=jnp.float32) + b_ref[...]

        # Transpose the tile-aligned logits chunk so batch sits on the lane axis.
        lt = logits.T                                  # [128, chunk]
        l0 = lt[0:1, :]                                # [1, chunk]
        l1 = lt[1:2, :]
        l2 = lt[2:3, :]

        # Numerically-stable log-softmax over the 3 classes, fully lane-dense.
        m = jnp.maximum(jnp.maximum(l0, l1), l2)
        e0 = jnp.exp(l0 - m)
        e1 = jnp.exp(l1 - m)
        e2 = jnp.exp(l2 - m)
        s = e0 + e1 + e2
        lse = jnp.log(s) + m
        ls0 = l0 - lse
        ls1 = l1 - lse
        ls2 = l2 - lse

        u = u_ref[0:1, rows]                           # [1, chunk] uniforms in [0,1)
        if greedy:
            # Categorical(softmax(logits)).sample() via inverse CDF:
            # compare u * sum(exp) against cumulative (unnormalized) probabilities.
            us = u * s
            a = (us > e0).astype(jnp.int32) + (us > (e0 + e1)).astype(jnp.int32)
        else:
            # torch.randint(0, 3, (B,)) equivalent.
            a = jnp.minimum(jnp.floor(u * 3.0), 2.0).astype(jnp.int32)

        # logpi = log_softmax(logits)[row, a]  (3-way select, lane-dense)
        logpi = jnp.where(a == 0, ls0, jnp.where(a == 1, ls1, ls2))

        logpi_ref[0:1, rows] = logpi
        a_ref[0:1, rows] = a - 1


def prepare_fc_params(weight, bias):
    """One-time param prep: transpose to [in, out], pad out dim to 128 lanes.

    weight: [3, 256] (PyTorch nn.Linear layout), bias: [3].
    Returns (w_pad [256, 128] bf16, b_pad [1, 128] f32).
    Call once per parameter update, not per environment step.
    """
    w_pad = jnp.zeros((H_IN, N_PAD), jnp.bfloat16).at[:, :N_ACT].set(
        weight.astype(jnp.bfloat16).T)
    b_pad = jnp.zeros((1, N_PAD), jnp.float32).at[:, :N_ACT].set(
        bias.astype(jnp.float32).reshape(1, N_ACT))
    return w_pad, b_pad


@functools.partial(jax.jit, static_argnames=("greedy",))
def catch_action(h, w_pad, b_pad, key, greedy=True):
    """h: [B, 256]; w_pad/b_pad from prepare_fc_params; key: PRNG key.

    Returns (logpi [B] f32, action [B] i32 in {-1, 0, 1}).
    """
    B = h.shape[0]

    # Batch tile: single tile for small B; for larger B pick a tile that yields a
    # grid of >= 2 (so v7x's two TensorCores both participate), capped at MAX_TB.
    if B <= 256:
        TB = B
    else:
        TB = min(MAX_TB, _round_up((B + 1) // 2, 256))
    chunk = CHUNK if TB % CHUNK == 0 else TB

    # Exactly one uniform per batch row, lane-dense (1, B).
    u = jax.random.uniform(key, (1, B), dtype=jnp.float32)

    # Real work: flops = 2*B*256*3; dominant bytes = bf16 h stream.
    cost = pl.CostEstimate(
        flops=2 * B * H_IN * N_ACT,
        bytes_accessed=B * H_IN * 2 + H_IN * N_PAD * 2 + B * 4 * 3,
        transcendentals=4 * B,
    )

    kernel = functools.partial(_catch_action_kernel, greedy=greedy, chunk=chunk)
    logpi, a = pl.pallas_call(
        kernel,
        out_shape=(
            jax.ShapeDtypeStruct((1, B), jnp.float32),
            jax.ShapeDtypeStruct((1, B), jnp.int32),
        ),
        grid=(pl.cdiv(B, TB),),
        in_specs=[
            pl.BlockSpec((TB, H_IN), lambda i: (i, 0)),     # h tile (bf16)
            pl.BlockSpec((H_IN, N_PAD), lambda i: (0, 0)),  # padded weight (resident)
            pl.BlockSpec((1, N_PAD), lambda i: (0, 0)),     # padded bias (f32)
            pl.BlockSpec((1, TB), lambda i: (0, i)),        # uniforms
        ],
        out_specs=(
            pl.BlockSpec((1, TB), lambda i: (0, i)),        # logpi
            pl.BlockSpec((1, TB), lambda i: (0, i)),        # action
        ),
        compiler_params=pltpu.CompilerParams(dimension_semantics=("parallel",)),
        cost_estimate=cost,
    )(h.astype(jnp.bfloat16), w_pad, b_pad, u)
    return logpi[0], a[0]


if __name__ == "__main__":
    key = jax.random.PRNGKey(0)
    k_h, k_w, k_b, k_u1, k_u2 = jax.random.split(key, 5)

    B = 8
    h = jax.random.normal(k_h, (B, H_IN), dtype=jnp.float32)

    # Deterministic fc params, matching nn.Linear(256, 3) init range (+/- 1/sqrt(256)).
    bound = 1.0 / (H_IN ** 0.5)
    w = jax.random.uniform(k_w, (N_ACT, H_IN), jnp.float32, -bound, bound)  # [out, in]
    b = jax.random.uniform(k_b, (N_ACT,), jnp.float32, -bound, bound)

    w_pad, b_pad = prepare_fc_params(w, b)

    # greedy=True branch: sample from Categorical(softmax(fc(h)))
    logpi, act = catch_action(h, w_pad, b_pad, k_u1, greedy=True)
    jax.block_until_ready((logpi, act))

    # greedy=False branch: uniform random action in {0,1,2} (returned shifted by -1)
    logpi2, act2 = catch_action(h, w_pad, b_pad, k_u2, greedy=False)
    jax.block_until_ready((logpi2, act2))

    assert logpi.shape == (B,) and act.shape == (B,)
    assert bool(jnp.all((act >= -1) & (act <= 1)))
    assert bool(jnp.all((act2 >= -1) & (act2 <= 1)))

    # Cross-check logpi against a pure-JAX f32 reference of the forward pass
    # (bf16 h stream gives ~1e-3 relative error on logits, well inside tolerance).
    logits_ref = h @ w.T + b
    logsm_ref = jax.nn.log_softmax(logits_ref, axis=-1)
    lp_ref = jnp.take_along_axis(logsm_ref, (act + 1)[:, None], axis=-1)[:, 0]
    lp2_ref = jnp.take_along_axis(logsm_ref, (act2 + 1)[:, None], axis=-1)[:, 0]
    assert bool(jnp.allclose(logpi, lp_ref, atol=1e-2, rtol=1e-2))
    assert bool(jnp.allclose(logpi2, lp2_ref, atol=1e-2, rtol=1e-2))

    print("KERNEL_OK")
</pallas_src>

<mosaic_0001>
module attributes {stable_mosaic.version = 11 : i64} {
  func.func @_catch_action_kernel(%arg0: i32, %arg1: memref<8x256xbf16, #tpu.memory_space<vmem>>, %arg2: memref<256x128xbf16, #tpu.memory_space<vmem>>, %arg3: memref<1x128xf32, #tpu.memory_space<vmem>>, %arg4: memref<1x8xf32, #tpu.memory_space<vmem>>, %arg5: memref<1x8xf32, #tpu.memory_space<vmem>>, %arg6: memref<1x8xi32, #tpu.memory_space<vmem>>) attributes {dimension_semantics = [#tpu.dimension_semantics<parallel>], iteration_bounds = array<i64: 1>, scalar_prefetch = 0 : i64, scratch_operands = 0 : i64, tpu.core_type = #tpu.core_type<tc>, window_params = [{transform_indices = @transform_0, window_bounds = array<i64: 8, 256>}, {pipeline_mode = #tpu.pipeline_mode<synchronous>, transform_indices = @transform_1, window_bounds = array<i64: 256, 128>}, {pipeline_mode = #tpu.pipeline_mode<synchronous>, transform_indices = @transform_2, window_bounds = array<i64: 1, 128>}, {transform_indices = @transform_3, window_bounds = array<i64: 1, 8>}, {transform_indices = @transform_4, window_bounds = array<i64: 1, 8>}, {transform_indices = @transform_5, window_bounds = array<i64: 1, 8>}]} {
    %c0 = arith.constant 0 : index
    %c0_0 = arith.constant 0 : index
    %0 = vector.load %arg1[%c0, %c0_0] : memref<8x256xbf16, #tpu.memory_space<vmem>>, vector<8x256xbf16>
    %c0_1 = arith.constant 0 : index
    %c0_2 = arith.constant 0 : index
    %1 = vector.load %arg2[%c0_1, %c0_2] : memref<256x128xbf16, #tpu.memory_space<vmem>>, vector<256x128xbf16>
    %cst = arith.constant dense<0.000000e+00> : vector<8x128xf32>
    %2 = tpu.matmul %0, %1, %cst {dimension_numbers = #tpu.dot_dimension_numbers<[1], [0], [0], [1], [0, 0, 1, 1], [], []>} : vector<8x256xbf16>, vector<256x128xbf16>, vector<8x128xf32> -> vector<8x128xf32>
    %c0_3 = arith.constant 0 : index
    %c0_4 = arith.constant 0 : index
    %3 = vector.load %arg3[%c0_3, %c0_4] : memref<1x128xf32, #tpu.memory_space<vmem>>, vector<1x128xf32>
    %4 = vector.broadcast %3 : vector<1x128xf32> to vector<8x128xf32>
    %5 = arith.addf %2, %4 : vector<8x128xf32>
    %6 = tpu.transpose %5, [1, 0] : vector<8x128xf32> -> vector<128x8xf32>
    %7 = vector.extract_strided_slice %6 {offsets = [0, 0], sizes = [1, 8], strides = [1, 1]} : vector<128x8xf32> to vector<1x8xf32>
    %8 = vector.extract_strided_slice %6 {offsets = [1, 0], sizes = [1, 8], strides = [1, 1]} : vector<128x8xf32> to vector<1x8xf32>
    %9 = vector.extract_strided_slice %6 {offsets = [2, 0], sizes = [1, 8], strides = [1, 1]} : vector<128x8xf32> to vector<1x8xf32>
    %10 = arith.maximumf %7, %8 : vector<1x8xf32>
    %11 = arith.maximumf %10, %9 : vector<1x8xf32>
    %12 = arith.subf %7, %11 : vector<1x8xf32>
    %13 = math.exp %12 : vector<1x8xf32>
    %14 = arith.subf %8, %11 : vector<1x8xf32>
    %15 = math.exp %14 : vector<1x8xf32>
    %16 = arith.subf %9, %11 : vector<1x8xf32>
    %17 = math.exp %16 : vector<1x8xf32>
    %18 = arith.addf %13, %15 : vector<1x8xf32>
    %19 = arith.addf %18, %17 : vector<1x8xf32>
    %20 = math.log %19 : vector<1x8xf32>
    %21 = arith.addf %20, %11 : vector<1x8xf32>
    %22 = arith.subf %7, %21 : vector<1x8xf32>
    %23 = arith.subf %8, %21 : vector<1x8xf32>
    %24 = arith.subf %9, %21 : vector<1x8xf32>
    %c0_5 = arith.constant 0 : index
    %c0_6 = arith.constant 0 : index
    %25 = vector.load %arg4[%c0_5, %c0_6] : memref<1x8xf32, #tpu.memory_space<vmem>>, vector<1x8xf32>
    %26 = arith.mulf %25, %19 : vector<1x8xf32>
    %27 = arith.cmpf ogt, %26, %13 : vector<1x8xf32>
    %28 = arith.extui %27 : vector<1x8xi1> to vector<1x8xi32>
    %29 = arith.addf %13, %15 : vector<1x8xf32>
    %30 = arith.cmpf ogt, %26, %29 : vector<1x8xf32>
    %31 = arith.extui %30 : vector<1x8xi1> to vector<1x8xi32>
    %32 = arith.addi %28, %31 : vector<1x8xi32>
    %c0_i32 = arith.constant 0 : i32
    %33 = vector.broadcast %c0_i32 : i32 to vector<1x8xi32>
    %34 = arith.cmpi eq, %32, %33 : vector<1x8xi32>
    %c1_i32 = arith.constant 1 : i32
    %35 = vector.broadcast %c1_i32 : i32 to vector<1x8xi32>
    %36 = arith.cmpi eq, %32, %35 : vector<1x8xi32>
    %37 = arith.select %36, %23, %24 : vector<1x8xi1>, vector<1x8xf32>
    %38 = arith.select %34, %22, %37 : vector<1x8xi1>, vector<1x8xf32>
    %c0_7 = arith.constant 0 : index
    %c0_8 = arith.constant 0 : index
    %39 = vector.load %arg5[%c0_7, %c0_8] : memref<1x8xf32, #tpu.memory_space<vmem>>, vector<1x8xf32>
    tpu.vector_store %arg5[%c0_7, %c0_8], %38 {strides = array<i32>} : memref<1x8xf32, #tpu.memory_space<vmem>>, vector<1x8xf32>,
    %c1_i32_9 = arith.constant 1 : i32
    %40 = vector.broadcast %c1_i32_9 : i32 to vector<1x8xi32>
    %41 = arith.subi %32, %40 : vector<1x8xi32>
    %c0_10 = arith.constant 0 : index
    %c0_11 = arith.constant 0 : index
    %42 = vector.load %arg6[%c0_10, %c0_11] : memref<1x8xi32, #tpu.memory_space<vmem>>, vector<1x8xi32>
    tpu.vector_store %arg6[%c0_10, %c0_11], %41 {strides = array<i32>} : memref<1x8xi32, #tpu.memory_space<vmem>>, vector<1x8xi32>,
    return
  }
  func.func @transform_0(%arg0: i32) -> (i32, i32) {
    %c0_i32 = arith.constant 0 : i32
    %c0_i32_0 = arith.constant 0 : i32
    return %arg0, %c0_i32 : i32, i32
  }
  func.func @transform_1(%arg0: i32) -> (i32, i32) {
    %c0_i32 = arith.constant 0 : i32
    %c0_i32_0 = arith.constant 0 : i32
    %c0_i32_1 = arith.constant 0 : i32
    return %c0_i32, %c0_i32_0 : i32, i32
  }
  func.func @transform_2(%arg0: i32) -> (i32, i32) {
    %c0_i32 = arith.constant 0 : i32
    %c0_i32_0 = arith.constant 0 : i32
    %c0_i32_1 = arith.constant 0 : i32
    return %c0_i32, %c0_i32_0 : i32, i32
  }
  func.func @transform_3(%arg0: i32) -> (i32, i32) {
    %c0_i32 = arith.constant 0 : i32
    %c0_i32_0 = arith.constant 0 : i32
    return %c0_i32, %arg0 : i32, i32
  }
  func.func @transform_4(%arg0: i32) -> (i32, i32) {
    %c0_i32 = arith.constant 0 : i32
    %c0_i32_0 = arith.constant 0 : i32
    return %c0_i32, %arg0 : i32, i32
  }
  func.func @transform_5(%arg0: i32) -> (i32, i32) {
    %c0_i32 = arith.constant 0 : i32
    %c0_i32_0 = arith.constant 0 : i32
    return %c0_i32, %arg0 : i32, i32
  }
}

</mosaic_0001>

<bundles_post_ra>
// kernel: catch_action.1
= control target key start
LH: loop header
LB: loop body
LE: loop exit
PB: predicated region body
PF: predicated region fallthrough
CT: control target
= control target key end

     0   :  { %11 = vsyncpa [#allocation3], 0  ;;  %s575_s0 = inlined_call_operand.vmem [shape: bf16[8,256], index: 0, kind: input, shape index: {}]   ;;  %s576_s1 = inlined_call_operand.hbm [shape: bf16[256,128], index: 1, kind: input, shape index: {}]   ;;  %s577_s2 = inlined_call_operand.vmem [shape: f32[1,128], index: 2, kind: input, shape index: {}]   ;;  %s578_s3 = inlined_call_operand.vmem [shape: f32[1,8], index: 3, kind: input, shape index: {}]   ;;  %s579_s4 = inlined_call_operand.hbm [shape: f32[1,8], index: 4, kind: output, shape index: {0}]   ;;  %s580_s5 = inlined_call_operand.hbm [shape: s32[1,8], index: 5, kind: output, shape index: {1}]  }
   0x1   :  { %12 = vsyncpa [#allocation4], 0 }
   0x2   :  { %13 = vsyncpa [#allocation7], 0  ;;  %s20_s20 = sshll.u32 %s576_s1, 4  ;;  %s508_s21 = smov [#allocation2]   ;;  %s21_s20 = int_to_ptr.hbm [resolvable:$true] %s20_s20 }
   0x3   :  { %s22_s22 = sshll.u32 %s508_s21, 4  ;;  %s509_s23 = smov 64   ;;  %s23_s22 = int_to_ptr.vmem [resolvable:$true] %s22_s22 }
   0x4   :  { %s510_s24 = smov 4  }
   0x5   :  { %28 = dma.hbm_to_vmem [thread:$0]  %s21_s20, 2048, %s23_s22, [#allocation3], %s509_s23, %s509_s23, %s510_s24  }
   0x6   :  { %502 = dma.done.wait [#allocation3], 2048  }
   0x7   :  { %503 = vsyncadd [#allocation3], 4294965248  ;;  %v405_v0 = vld [vmem:[#allocation2 + $0x38] sm:$0xff]  ;;  %v404_v2 = vld [vmem:[#allocation2 + $0x30] sm:$0xff]  ;;  %v511_v50 = vmov 0   ;;  %s512_s28 = smov [#allocation6]  }
   0x8   :  { %v413_v1 = vld [vmem:[#allocation2 + $0x78] sm:$0xff]  ;;  %177 = vmatpush.bf16.msra.mxu0 %v405_v0  ;;  %v412_v3 = vld [vmem:[#allocation2 + $0x70] sm:$0xff]  ;;  %v403_v4 = vld [vmem:[#allocation2 + $0x28] sm:$0xff]  ;;  %s316_s29 = sshll.u32 %s512_s28, 4  ;;  %s318_s7 = sshll.u32 %s580_s5, 4  ;;  %vm296_vm2 = vcmask 57344   ;;  %s317_s29 = int_to_ptr.vmem [resolvable:$true] %s316_s29  ;;  %s319_s7 = int_to_ptr.hbm [resolvable:$true] %s318_s7 }
   0x9   :  { %190 = vmatpush.bf16.msra.mxu1 %v413_v1  ;;  %v411_v5 = vld [vmem:[#allocation2 + $0x68] sm:$0xff]  ;;  %v402_v6 = vld [vmem:[#allocation2 + $0x20] sm:$0xff]  ;;  %v401_v8 = vld [vmem:[#allocation2 + $0x18] sm:$0xff]  ;;  %s307_s10 = sshll.u32 %s579_s4, 4  ;;  %s308_s10 = int_to_ptr.hbm [resolvable:$true] %s307_s10 }
   0xa   :  { %v410_v7 = vld [vmem:[#allocation2 + $0x60] sm:$0xff]  ;;  %v409_v9 = vld [vmem:[#allocation2 + $0x58] sm:$0xff]  ;;  %v400_v10 = vld [vmem:[#allocation2 + $0x10] sm:$0xff] }
   0xb   :  { %v408_v11 = vld [vmem:[#allocation2 + $0x50] sm:$0xff]  ;;  %v399_v12 = vld [vmem:[#allocation2 + $0x8] sm:$0xff]  ;;  %v37_v14 = vld [vmem:[%s575_s0] sm:$0xff] }
   0xc   :  { %178 = vmatpush.bf16.msra.mxu0 %v404_v2  ;;  %v407_v13 = vld [vmem:[#allocation2 + $0x48] sm:$0xff]  ;;  %v75_v15 = vunpack.c.l.b16 %v37_v14  ;;  %v76_v16 = vunpack.c.h.b16 %v37_v14  ;;  %v398_v17 = vld [vmem:[#allocation2] sm:$0xff]  ;;  %v421_v21 = vld [vmem:[%s577_s2] ss:$0 sm:$0xff] }
   0xd   :  { %191 = vmatpush.bf16.msra.mxu1 %v412_v3  ;;  %v406_v18 = vld [vmem:[#allocation2 + $0x40] sm:$0xff]  ;;  %v275_v47 = vld [vmem:[%s578_s3] sm:$0x1]  ;;  %s513_s3 = smov [#allocation5]  }
   0xe   :  { %v77_v19 = vpack.c.b16 %v75_v15, %v75_v15  ;;  %v78_v20 = vpack.c.b16 %v76_v16, %v76_v16  ;;  %s305_s5 = sshll.u32 %s513_s3, 4  ;;  %s306_s5 = int_to_ptr.vmem [resolvable:$true] %s305_s5 }
  0x10   :  { %179 = vmatpush.bf16.msra.mxu0 %v403_v4 }
  0x11   :  { %192 = vmatpush.bf16.msra.mxu1 %v411_v5 }
  0x14   :  { %180 = vmatpush.bf16.msra.mxu0 %v402_v6 }
  0x15   :  { %193 = vmatpush.bf16.msra.mxu1 %v410_v7 }
  0x18   :  { %181 = vmatpush.bf16.msra.mxu0 %v401_v8 }
  0x19   :  { %194 = vmatpush.bf16.msra.mxu1 %v409_v9 }
  0x1c   :  { %182 = vmatpush.bf16.msra.mxu0 %v400_v10 }
  0x1d   :  { %195 = vmatpush.bf16.msra.mxu1 %v408_v11 }
  0x20   :  { %183 = vmatpush.bf16.msra.mxu0 %v399_v12 }
  0x21   :  { %196 = vmatpush.bf16.msra.mxu1 %v407_v13 }
  0x24   :  { %184 = vmatpush.bf16.msra.mxu0 %v398_v17 }
  0x25   :  { %197 = vmatpush.bf16.msra.mxu1 %v406_v18 }
  0x27   :  { %185 = vmatmul.bf16.vlgmr.msra.gmra.mxu0 %v77_v19 }
  0x28   :  { %198 = vmatmul.bf16.vlgmr.msra.gmra.mxu1 %v78_v20 }
  0xa4   :  { %v186_v22 = vpop.f32.mrf.mxu0 }
  0xa5   :  { %v199_v23 = vpop.f32.mrf.mxu1  ;;  %v187_v24 = vadd.f32 %v421_v21, %v186_v22 }
  0xa7   :  { %v200_v25 = vadd.f32 %v199_v23, %v187_v24 }
  0xa9   :  { %203 = vxpose.xlu0.b32.start.end [1/1] (short) (narrow) %v200_v25, 8 }
  0xac   :  { %v188_v26 = vpop.f32.mrf.mxu0 }
  0xad   :  { %v201_v27 = vpop.f32.mrf.mxu1 }
 0x14d   :  { %v553_v28 = vpop.trf.xlu0 }
 0x14e   :  { %v236_v29 = vrot.slane %v553_v28, 1  ;;  %v239_v31 = vrot.slane %v553_v28, 2 }
 0x150   :  { %v238_v30 = vmax.f32 %v553_v28, %v236_v29 }
 0x152   :  { %v241_v32 = vmax.f32 %v238_v30, %v239_v31 }
 0x154   :  { %v246_v33 = vrot.slane %v241_v32, 7  ;;  %v251_v34 = vrot.slane %v241_v32, 6  ;;  %v242_v35 = vsub.f32 %v553_v28, %v241_v32 }
 0x156   :  { %v248_v36 = vsub.f32 %v553_v28, %v246_v33  ;;  %v253_v37 = vsub.f32 %v553_v28, %v251_v34  ;;  %v243_v40 = vmul.f32 1.442695, %v242_v35 }
 0x158   :  { %v249_v38 = vmul.f32 1.442695, %v248_v36  ;;  %v254_v39 = vmul.f32 1.442695, %v253_v37 }
 0x15a   :  { %422 = vpow2.f32 %v254_v39 }
 0x15b   :  { %424 = vpow2.f32 %v249_v38 }
 0x15c   :  { %426 = vpow2.f32 %v243_v40 }
 0x160   :  { %v423_v41 = vpop.eup %422 }
 0x161   :  { %v425_v42 = vpop.eup %424  ;;  %v261_v46 = vrot.slane %v423_v41, 2 }
 0x162   :  { %v257_v43 = vrot.slane %v425_v42, 1  ;;  %v427_v44 = vpop.eup %426 }
 0x164   :  { %v259_v45 = vadd.f32 %v427_v44, %v257_v43 }
 0x166   :  { %v263_v48 = vadd.f32 %v261_v46, %v259_v45 }
 0x168   :  { %428 = vlog2.f32 %v263_v48  ;;  %v276_v49 = vmul.f32 %v275_v47, %v263_v48 }
 0x16a   :  { %vm277_vm0 = vcmp.gt.f32.partialorder %v276_v49, %v427_v44  ;;  %vm279_vm1 = vcmp.gt.f32.partialorder %v276_v49, %v259_v45 }
 0x16b   :  { %v278_v51 = vsel %vm277_vm0, 1, %v511_v50  ;;  %v280_v52 = vsel %vm279_vm1, 1, %v511_v50 }
 0x16c   :  { %v281_v53 = vadd.s32 %v280_v52, %v278_v51 }
 0x16e   :  { %v429_v54 = vpop.eup %428  ;;  %v397_v55 = vadd.s32 4294967295, %v281_v53  ;;  %vm283_vm3 = vcmp.eq.s32.totalorder %v281_v53, 1  ;;  %vm282_vm4 = vcmp.eq.s32.totalorder %v281_v53, 0 }
 0x16f   :  { %v265_v56 = vmul.f32 0.6931472, %v429_v54 }
 0x170   :  { %299 = vst.msk [vmem:[#allocation6] sm:$0x1] %vm296_vm2, %v397_v55 }
 0x171   :  { %v266_v57 = vadd.f32 %v265_v56, %v241_v32  ;;  %321 = dma.vmem_to_hbm [thread:$0]  %s317_s29, 16, %s319_s7, [#allocation7]  }
 0x173   :  { %v269_v58 = vrot.slane %v266_v57, 7  ;;  %v272_v60 = vrot.slane %v266_v57, 6  ;;  %v267_v63 = vsub.f32 %v553_v28, %v266_v57 }
 0x175   :  { %v271_v59 = vsub.f32 %v553_v28, %v269_v58  ;;  %v274_v61 = vsub.f32 %v553_v28, %v272_v60 }
 0x177   :  { %285 = vst [vmem:[#allocation1] sm:$0xff] %v271_v59 }
 0x17e   :  { %v287_v62 = vld [vmem:[#allocation1 + $0x1] ss:$9 sm:$0xff] }
 0x17f   :  { %290 = vst [vmem:[#allocation1] sm:$0xff] %v274_v61 }
 0x186   :  { %v292_v0 = vld [vmem:[#allocation1 + $0x2] ss:$9 sm:$0xff] }
 0x187   :  { %v294_v1 = vsel %vm283_vm3, %v287_v62, %v292_v0 }
 0x188   :  { %v295_v2 = vsel %vm282_vm4, %v267_v63, %v294_v1 }
 0x189   :  { %297 = vst.msk [vmem:[#allocation5] sm:$0x1] %vm296_vm2, %v295_v2 }
 0x18a   :  { %310 = dma.vmem_to_hbm [thread:$0]  %s306_s5, 16, %s308_s10, [#allocation4]  }
 0x18b   :  { %504 = dma.done.wait [#allocation4], 16  }
 0x18c   :  { %505 = vsyncadd [#allocation4], 4294967280 }
 0x18d   :  { %506 = dma.done.wait [#allocation7], 16  }
 0x18e   :  { %507 = vsyncadd [#allocation7], 4294967280 }
 0x18f   :  { %330 = vsyncpa [#allocation3], 1 }
 0x190   :  { %331 = vsyncpa [#allocation4], 1 }
 0x191   :  { %332 = vsyncpa [#allocation7], 1 }

</bundles_post_ra>
